<compile_context>
chip_gen: v6e
topology: v6e:2x2x1
jax: 0.10.0
libtpu: 0.0.40
codegen_flags: <defaults>
</compile_context>

<pallas_src>
import jax
import jax.numpy as jnp
from jax.experimental import pallas as pl
from jax.experimental.pallas import tpu as pltpu


def _residual_add_linear_kernel(x_ref, w_ref, b_ref, o_ref):
    """One (row, col) tile: o = x @ W[:, j-tile] + b[j-tile] + x[:, j-tile]."""
    tn = o_ref.shape[-1]
    j = pl.program_id(1)

    x = x_ref[...]                                          # (tm, Hp)
    y = jnp.dot(x, w_ref[...],
                preferred_element_type=jnp.float32)         # MXU, f32 acc
    y = y + b_ref[...].astype(jnp.float32)                  # bias broadcast

    col0 = pl.multiple_of(j * tn, tn)                       # lane-aligned start
    res = x_ref[:, pl.ds(col0, tn)]                         # residual columns
    o_ref[...] = (y + res.astype(jnp.float32)).astype(o_ref.dtype)


def _round_up(a, m):
    return ((a + m - 1) // m) * m


def residual_add_linear(x, w, b, *, tile_rows=256, tile_n=512):
    """ResidualAdd(Linear):  out = x @ w + b + x,  x:[B,S,H], w:[H,H], b:[H]."""
    B, S, H = x.shape
    rows = B * S

    # ---- lane-dense hidden: pad H up to a multiple of 128 ------------------
    Hp = _round_up(max(H, 128), 128)

    # ---- sublane-correct row tile (8 for f32, 16 for bf16, 32 for int8) ----
    sub = 8 if x.dtype.itemsize == 4 else (16 if x.dtype.itemsize == 2 else 32)
    tm = min(_round_up(tile_rows, sub), _round_up(rows, sub))
    rows_pad = _round_up(rows, tm)

    # ---- N-tile over W's output dim (keeps VMEM bounded for large H) -------
    tn = min(_round_up(tile_n, 128), Hp)
    while Hp % tn != 0:          # Hp is a multiple of 128, so this terminates
        tn -= 128

    # ---- zero-pad operands (padded output cols are exactly 0, sliced off) --
    x2 = jnp.zeros((rows_pad, Hp), x.dtype).at[:rows, :H].set(x.reshape(rows, H))
    w2 = jnp.zeros((Hp, Hp), w.dtype).at[:H, :H].set(w)
    b2 = jnp.zeros((1, Hp), b.dtype).at[0, :H].set(b)

    grid = (rows_pad // tm, Hp // tn)

    # ---- explicit VMEM budget for the chosen tiles (double-buffered) -------
    itm = x.dtype.itemsize
    vmem_bytes = (2 * tm * Hp * itm                 # x row tiles
                  + 2 * Hp * tn * w.dtype.itemsize  # W column tiles
                  + 2 * tn * b.dtype.itemsize       # bias tiles
                  + 2 * tm * tn * itm)              # out tiles
    vmem_limit = int(min(64 * 2**20, max(32 * 2**20, 2 * vmem_bytes)))

    out2 = pl.pallas_call(
        _residual_add_linear_kernel,
        out_shape=jax.ShapeDtypeStruct((rows_pad, Hp), x.dtype),
        grid_spec=pltpu.PrefetchScalarGridSpec(
            num_scalar_prefetch=0,
            grid=grid,
            in_specs=[
                pl.BlockSpec((tm, Hp), lambda i, j: (i, 0)),   # x row tile (full K)
                pl.BlockSpec((Hp, tn), lambda i, j: (0, j)),   # W column tile
                pl.BlockSpec((1, tn), lambda i, j: (0, j)),    # bias tile
            ],
            out_specs=pl.BlockSpec((tm, tn), lambda i, j: (i, j)),
        ),
        compiler_params=pltpu.CompilerParams(
            dimension_semantics=("parallel", "parallel"),
            vmem_limit_bytes=vmem_limit),
    )(x2, w2, b2)

    return out2[:rows, :H].reshape(B, S, H)


if __name__ == "__main__":
    # Small transformer-style residual-block shapes: batch=2, seq=8, hidden=32.
    B, S, H = 2, 8, 32
    key = jax.random.PRNGKey(0)
    kx, kw, kb = jax.random.split(key, 3)

    x = jax.random.normal(kx, (B, S, H), dtype=jnp.float32)
    # Deterministic parameter init for fn = Linear(H, H).
    w = (jax.random.normal(kw, (H, H), dtype=jnp.float32) / jnp.sqrt(H)).astype(jnp.float32)
    b = jax.random.normal(kb, (H,), dtype=jnp.float32) * 0.01

    out = residual_add_linear(x, w, b)
    out = jax.block_until_ready(out)

    # Reference check (plain JAX) of ResidualAdd semantics: fn(x) + x.
    ref = (x.reshape(-1, H) @ w + b).reshape(B, S, H) + x
    assert jnp.allclose(out, ref, atol=1e-5, rtol=1e-5), "mismatch vs reference"

    # TODO(synk): for bf16/fp8 deployments, cast x/W to bf16 before the call
    # (MXU-native on v6e/v7x); kept f32 here to match the PyTorch reference.
    print("KERNEL_OK")
</pallas_src>

<mosaic_0001>
module attributes {stable_mosaic.version = 11 : i64} {
  func.func @_residual_add_linear_kernel(%arg0: i32, %arg1: i32, %arg2: memref<16x128xf32, #tpu.memory_space<vmem>>, %arg3: memref<128x128xf32, #tpu.memory_space<vmem>>, %arg4: memref<1x128xf32, #tpu.memory_space<vmem>>, %arg5: memref<16x128xf32, #tpu.memory_space<vmem>>) attributes {dimension_semantics = [#tpu.dimension_semantics<parallel>, #tpu.dimension_semantics<parallel>], iteration_bounds = array<i64: 1, 1>, scalar_prefetch = 0 : i64, scratch_operands = 0 : i64, tpu.core_type = #tpu.core_type<tc>, window_params = [{transform_indices = @transform_0, window_bounds = array<i64: 16, 128>}, {transform_indices = @transform_1, window_bounds = array<i64: 128, 128>}, {transform_indices = @transform_2, window_bounds = array<i64: 1, 128>}, {transform_indices = @transform_3, window_bounds = array<i64: 16, 128>}]} {
    %c0 = arith.constant 0 : index
    %c0_0 = arith.constant 0 : index
    %0 = vector.load %arg2[%c0, %c0_0] : memref<16x128xf32, #tpu.memory_space<vmem>>, vector<16x128xf32>
    %c0_1 = arith.constant 0 : index
    %c0_2 = arith.constant 0 : index
    %1 = vector.load %arg3[%c0_1, %c0_2] : memref<128x128xf32, #tpu.memory_space<vmem>>, vector<128x128xf32>
    %cst = arith.constant dense<0.000000e+00> : vector<16x128xf32>
    %2 = tpu.matmul %0, %1, %cst {dimension_numbers = #tpu.dot_dimension_numbers<[1], [0], [0], [1], [0, 0, 1, 1], [], []>} : vector<16x128xf32>, vector<128x128xf32>, vector<16x128xf32> -> vector<16x128xf32>
    %c0_3 = arith.constant 0 : index
    %c0_4 = arith.constant 0 : index
    %3 = vector.load %arg4[%c0_3, %c0_4] : memref<1x128xf32, #tpu.memory_space<vmem>>, vector<1x128xf32>
    %4 = vector.broadcast %3 : vector<1x128xf32> to vector<16x128xf32>
    %5 = arith.addf %2, %4 : vector<16x128xf32>
    %c128_i32 = arith.constant 128 : i32
    %6 = arith.muli %arg1, %c128_i32 : i32
    %7 = tpu.assume_multiple %6, 128 : i32
    %c0_5 = arith.constant 0 : index
    %8 = arith.index_cast %7 : i32 to index
    %9 = vector.load %arg2[%c0_5, %8] : memref<16x128xf32, #tpu.memory_space<vmem>>, vector<16x128xf32>
    %10 = arith.addf %5, %9 : vector<16x128xf32>
    %c0_6 = arith.constant 0 : index
    %c0_7 = arith.constant 0 : index
    %11 = vector.load %arg5[%c0_6, %c0_7] : memref<16x128xf32, #tpu.memory_space<vmem>>, vector<16x128xf32>
    tpu.vector_store %arg5[%c0_6, %c0_7], %10 {strides = array<i32>} : memref<16x128xf32, #tpu.memory_space<vmem>>, vector<16x128xf32>,
    return
  }
  func.func @transform_0(%arg0: i32, %arg1: i32) -> (i32, i32) {
    %c0_i32 = arith.constant 0 : i32
    %c0_i32_0 = arith.constant 0 : i32
    return %arg0, %c0_i32 : i32, i32
  }
  func.func @transform_1(%arg0: i32, %arg1: i32) -> (i32, i32) {
    %c0_i32 = arith.constant 0 : i32
    %c0_i32_0 = arith.constant 0 : i32
    return %c0_i32, %arg1 : i32, i32
  }
  func.func @transform_2(%arg0: i32, %arg1: i32) -> (i32, i32) {
    %c0_i32 = arith.constant 0 : i32
    %c0_i32_0 = arith.constant 0 : i32
    return %c0_i32, %arg1 : i32, i32
  }
  func.func @transform_3(%arg0: i32, %arg1: i32) -> (i32, i32) {
    %c0_i32 = arith.constant 0 : i32
    return %arg0, %arg1 : i32, i32
  }
}

</mosaic_0001>

<bundles_post_ra>
// kernel: tpu_custom_call.1
= control target key start
LH: loop header
LB: loop body
LE: loop exit
PB: predicated region body
PF: predicated region fallthrough
CT: control target
= control target key end

     0   :  { %8 = vsyncpa [#allocation3], 0  ;;  %s343_s0 = inlined_call_operand.hbm [shape: f32[16,128], index: 0, kind: input, shape index: {}]   ;;  %s344_s1 = inlined_call_operand.hbm [shape: f32[128,128], index: 1, kind: input, shape index: {}]   ;;  %s345_s2 = inlined_call_operand.vmem [shape: f32[1,128], index: 2, kind: input, shape index: {}]   ;;  %s346_s3 = inlined_call_operand.hbm [shape: f32[16,128], index: 3, kind: output, shape index: {}]  }
   0x1   :  { %9 = vsyncpa [#allocation6], 0 }
   0x2   :  { %10 = vsyncpa [#allocation4], 0  ;;  %s297_s12 = smov [#allocation2]  }
   0x3   :  { %s16_s13 = sshll.u32 %s297_s12, 4  ;;  %s17_s13 = int_to_ptr.vmem [resolvable:$true] %s16_s13 }
   0x4   :  { %s239_s14 = scalar_lea.vmem %s17_s13, 256  ;;  %p244_p1 = scmp.lt.s32.totalorder %s17_s13, %s17_s13 }
   0x5   :  { %p240_p0 = scmp.ne.s32.totalorder %s17_s13, %s239_s14  ;;  %p245_p2 = scmp.lt.s32.totalorder %s239_s14, %s239_s14 }
   0x7   :  { %p246_p3 = por %p245_p2, %p244_p1 }
   0x9   :  { %p247_p4 = pnand %p246_p3, %p240_p0 }
   0xb   :  { %250 = shalt.err (!%p247_p4)
}
   0xc   :  { %s298_s15 = smov 128   ;;  %s299_s16 = smov 8  }
   0xd   :  { %22 = dma.hbm_to_vmem [thread:$0]  %s343_s0, 256, %s17_s13, [#allocation3], %s298_s15, %s298_s15, %s299_s16  }
   0xe   :  { %s300_s19 = smov [#allocation5]  }
   0xf   :  { %s28_s20 = sshll.u32 %s300_s19, 4  ;;  %s29_s20 = int_to_ptr.vmem [resolvable:$true] %s28_s20 }
  0x10   :  { %s259_s21 = scalar_lea.vmem %s29_s20, 2048  ;;  %p264_p6 = scmp.lt.s32.totalorder %s29_s20, %s29_s20 }
  0x11   :  { %p260_p5 = scmp.ne.s32.totalorder %s29_s20, %s259_s21  ;;  %p265_p7 = scmp.lt.s32.totalorder %s259_s21, %s259_s21 }
  0x13   :  { %p266_p8 = por %p265_p7, %p264_p6 }
  0x15   :  { %p267_p9 = pnand %p266_p8, %p260_p5 }
  0x17   :  { %270 = shalt.err (!%p267_p9)
}
  0x18   :  { %34 = dma.hbm_to_vmem [thread:$0]  %s344_s1, 2048, %s29_s20, [#allocation6], %s298_s15, %s298_s15, %s299_s16  }
  0x19   :  { %291 = dma.done.wait [#allocation3], 256  }
  0x1a   :  { %292 = vsyncadd [#allocation3], 4294967040 }
  0x1b   :  { %293 = dma.done.wait [#allocation6], 2048  }
  0x1c   :  { %294 = vsyncadd [#allocation6], 4294965248  ;;  %v60_v0 = vld [vmem:[#allocation5 + $0x78] sm:$0xff]  ;;  %v59_v1 = vld [vmem:[#allocation5 + $0x70] sm:$0xff]  ;;  %s301_s24 = smov [#allocation7]  }
  0x1d   :  { %191 = vmatprep.subr.mxu0 %v60_v0  ;;  %v58_v2 = vld [vmem:[#allocation5 + $0x68] sm:$0xff]  ;;  %v57_v3 = vld [vmem:[#allocation5 + $0x60] sm:$0xff]  ;;  %v43_v4 = vld [vmem:[#allocation2] sm:$0xff]  ;;  %s158_s25 = sshll.u32 %s301_s24, 4  ;;  %s159_s25 = int_to_ptr.vmem [resolvable:$true] %s158_s25 }
  0x1e   :  { %192 = vmatpush3.msra.mxu0 %v60_v0  ;;  %v56_v5 = vld [vmem:[#allocation5 + $0x58] sm:$0xff]  ;;  %223 = vmatprep.mubr.f32.mxu0 %v43_v4  ;;  %v55_v6 = vld [vmem:[#allocation5 + $0x50] sm:$0xff]  ;;  %v54_v7 = vld [vmem:[#allocation5 + $0x48] sm:$0xff]  ;;  %s271_s26 = scalar_lea.vmem %s159_s25, 256  ;;  %p276_p11 = scmp.lt.s32.totalorder %s159_s25, %s159_s25 }
  0x1f   :  { %193 = vmatprep.subr.mxu0 %v59_v1  ;;  %v53_v8 = vld [vmem:[#allocation5 + $0x40] sm:$0xff]  ;;  %v52_v9 = vld [vmem:[#allocation5 + $0x38] sm:$0xff]  ;;  %v51_v10 = vld [vmem:[#allocation5 + $0x30] sm:$0xff]  ;;  %p272_p10 = scmp.ne.s32.totalorder %s159_s25, %s271_s26  ;;  %p277_p12 = scmp.lt.s32.totalorder %s271_s26, %s271_s26 }
  0x20   :  { %194 = vmatpush3.msra.mxu0 %v59_v1  ;;  %v50_v11 = vld [vmem:[#allocation5 + $0x28] sm:$0xff]  ;;  %v49_v12 = vld [vmem:[#allocation5 + $0x20] sm:$0xff]  ;;  %v48_v13 = vld [vmem:[#allocation5 + $0x18] sm:$0xff] }
  0x21   :  { %195 = vmatprep.subr.mxu0 %v58_v2  ;;  %v47_v14 = vld [vmem:[#allocation5 + $0x10] sm:$0xff]  ;;  %v46_v15 = vld [vmem:[#allocation5 + $0x8] sm:$0xff]  ;;  %v45_v16 = vld [vmem:[#allocation5] sm:$0xff]  ;;  %p278_p13 = por %p277_p12, %p276_p11 }
  0x22   :  { %196 = vmatpush3.msra.mxu0 %v58_v2  ;;  %v44_v17 = vld [vmem:[#allocation2 + $0x8] sm:$0xff]  ;;  %v172_v18 = vld [vmem:[%s345_s2] ss:$0 sm:$0xff] }
  0x23   :  { %197 = vmatprep.subr.mxu0 %v57_v3  ;;  %p279_p0 = pnand %p278_p13, %p272_p10 }
  0x24   :  { %198 = vmatpush3.msra.mxu0 %v57_v3 }
  0x25   :  { %199 = vmatprep.subr.mxu0 %v56_v5 }
  0x26   :  { %200 = vmatpush3.msra.mxu0 %v56_v5 }
  0x27   :  { %201 = vmatprep.subr.mxu0 %v55_v6 }
  0x28   :  { %202 = vmatpush3.msra.mxu0 %v55_v6 }
  0x29   :  { %203 = vmatprep.subr.mxu0 %v54_v7 }
  0x2a   :  { %204 = vmatpush3.msra.mxu0 %v54_v7 }
  0x2b   :  { %205 = vmatprep.subr.mxu0 %v53_v8 }
  0x2c   :  { %206 = vmatpush3.msra.mxu0 %v53_v8 }
  0x2d   :  { %207 = vmatprep.subr.mxu0 %v52_v9 }
  0x2e   :  { %208 = vmatpush3.msra.mxu0 %v52_v9 }
  0x2f   :  { %209 = vmatprep.subr.mxu0 %v51_v10 }
  0x30   :  { %210 = vmatpush3.msra.mxu0 %v51_v10 }
  0x31   :  { %211 = vmatprep.subr.mxu0 %v50_v11 }
  0x32   :  { %212 = vmatpush3.msra.mxu0 %v50_v11 }
  0x33   :  { %213 = vmatprep.subr.mxu0 %v49_v12 }
  0x34   :  { %214 = vmatpush3.msra.mxu0 %v49_v12 }
  0x35   :  { %215 = vmatprep.subr.mxu0 %v48_v13 }
  0x36   :  { %216 = vmatpush3.msra.mxu0 %v48_v13 }
  0x37   :  { %217 = vmatprep.subr.mxu0 %v47_v14 }
  0x38   :  { %218 = vmatpush3.msra.mxu0 %v47_v14 }
  0x39   :  { %219 = vmatprep.subr.mxu0 %v46_v15 }
  0x3a   :  { %220 = vmatpush3.msra.mxu0 %v46_v15 }
  0x3b   :  { %221 = vmatprep.subr.mxu0 %v45_v16 }
  0x3c   :  { %222 = vmatpush3.msra.mxu0 %v45_v16 }
  0x3d   :  { %224 = vmatmul.mubr.f32.vlgmr.msra.gmra.mxu0 %v44_v17 }
  0xfd   :  { %v225_v19 = vpop.f32.mrf.mxu0 }
  0xfe   :  { %v140_v20 = vadd.f32 %v225_v19, %v172_v18 }
  0xff   :  { %v134_v21 = vpop.f32.mrf.mxu0 }
 0x100   :  { %v150_v22 = vadd.f32 %v140_v20, %v44_v17  ;;  %v135_v23 = vadd.f32 %v172_v18, %v134_v21 }
 0x102   :  { %152 = vst [vmem:[#allocation7 + $0x8] sm:$0xff] %v150_v22  ;;  %v149_v24 = vadd.f32 %v135_v23, %v43_v4 }
 0x104   :  { %151 = vst [vmem:[#allocation7] sm:$0xff] %v149_v24 }
 0x105   :  { %282 = shalt.err (!%p279_p0)
}
 0x106   :  { %164 = dma.vmem_to_hbm [thread:$0]  %s159_s25, 256, %s346_s3, [#allocation4], %s298_s15, %s298_s15, %s299_s16  }
 0x107   :  { %295 = dma.done.wait [#allocation4], 256  }
 0x108   :  { %296 = vsyncadd [#allocation4], 4294967040 }
 0x109   :  { %168 = vsyncpa [#allocation3], 1 }
 0x10a   :  { %169 = vsyncpa [#allocation6], 1 }
 0x10b   :  { %170 = vsyncpa [#allocation4], 1 }

</bundles_post_ra>
